<compile_context>
chip_gen: v7x
topology: tpu7x:2x2x1
jax: 0.10.0
libtpu: 0.0.40
codegen_flags: <defaults>
</compile_context>

<pallas_src>
import jax
import jax.numpy as jnp
from jax.experimental import pallas as pl
from jax.experimental.pallas import tpu as pltpu


def _make_gp_partial_kernel(B, TR, R_total, blocks_total, k_per_core, full_cover):
    """Builds a kernel producing per-core partial sum-of-squares, block [1, B, 128]."""
    need_tail = (blocks_total * TR) != R_total
    tail_rows = R_total - (blocks_total - 1) * TR        # valid rows in the last block

    def accumulate(g_ref, o_ref, masked):
        # In-kernel widening cast: gradient streams in its native dtype.
        g = g_ref[...].astype(jnp.float32)               # [B, TR, 128]
        if masked:
            # Only the last valid block can see out-of-range sublane rows.
            row = jax.lax.broadcasted_iota(jnp.int32, (B, TR, 128), 1)
            g = jnp.where(row < tail_rows, g, 0.0)       # select: garbage can't leak
        # Sublane-axis reduce of the already lane-dense tile -> [B, 128] lane partials.
        o_ref[...] += jnp.sum(g * g, axis=1)[None]

    def kernel(g_ref, o_ref):
        c = pl.program_id(0)                             # core / partial index
        k = pl.program_id(1)                             # reduction step for this core
        gb = c * k_per_core + k                          # global block index along R

        @pl.when(k == 0)
        def _init():
            o_ref[...] = jnp.zeros_like(o_ref)

        if need_tail:
            @pl.when(gb < blocks_total - 1)              # hot path: no mask
            def _hot():
                accumulate(g_ref, o_ref, False)

            @pl.when(gb == blocks_total - 1)             # masked tail block only
            def _tail():
                accumulate(g_ref, o_ref, True)
        elif full_cover:
            accumulate(g_ref, o_ref, False)              # every grid step is real work
        else:
            @pl.when(gb < blocks_total)                  # skip trailing empty blocks
            def _hot():
                accumulate(g_ref, o_ref, False)

    return kernel


def gradient_penalty_from_grads(grad_flat: jax.Array, *,
                                target_block_bytes: int = 6 * 1024 * 1024,
                                max_block_rows: int | None = None) -> jax.Array:
    """mean((||grad_i||_2 - 1)^2) over the batch; grad_flat is [B, D] in native dtype."""
    B, D = grad_flat.shape

    # TODO(synk): non-128-aligned D pays one extra HBM copy for the zero-pad; the
    # zeros contribute nothing to the sum of squares so no lane mask is needed.
    if D % 128:
        grad_flat = jnp.pad(grad_flat, ((0, 0), (0, 128 - D % 128)))
    R_total = grad_flat.shape[1] // 128
    g3 = grad_flat.reshape(B, R_total, 128)              # free view: lane/sublane dense

    itemsize = jnp.dtype(grad_flat.dtype).itemsize
    sub = {4: 8, 2: 16, 1: 32}.get(itemsize, 8)          # sublane tile for the dtype
    row_bytes = B * 128 * itemsize                       # bytes per r-row of the block

    # Target ~4-8 MiB blocks (here 6 MiB) to amortize per-grid-step overhead.
    max_tr = max(sub, ((target_block_bytes // row_bytes) // sub) * sub)
    if max_block_rows is not None:
        max_tr = max(sub, min(max_tr, (max_block_rows // sub) * sub))

    if R_total <= max_tr:
        TR = R_total                                     # single full-extent block
    else:
        TR = max_tr
        # Prefer a TR that divides R exactly (uniform steps, no tail mask) as long
        # as it does not shrink the block by more than 2x.
        cand = max_tr
        while cand >= sub and cand * 2 >= max_tr:
            if R_total % cand == 0:
                TR = cand
                break
            cand -= sub

    blocks_total = pl.cdiv(R_total, TR)
    # TODO(synk): core count hard-coded to 2 (v7x); on 1-TC chips the "parallel"
    # axis just iterates serially and the second partial stays zero -- still correct.
    NC = 2 if blocks_total >= 2 else 1
    k_per_core = pl.cdiv(blocks_total, NC)
    full_cover = (NC * k_per_core == blocks_total)

    block_bytes = B * TR * 128 * itemsize
    # Cover double-buffered input blocks + outputs, with margin; raises v5e's 16 MiB
    # default scoped VMEM, stays well under v7x's 64 MiB physical VMEM.
    vmem_limit = int(min(max(32 << 20, 3 * block_bytes + (8 << 20)), 48 << 20))

    def in_map(c, k):
        gb = c * k_per_core + k
        return (0, jnp.minimum(gb, blocks_total - 1), 0)  # clamp empty trailing blocks

    partials = pl.pallas_call(
        _make_gp_partial_kernel(B, TR, R_total, blocks_total, k_per_core, full_cover),
        out_shape=jax.ShapeDtypeStruct((NC, B, 128), jnp.float32),
        grid=(NC, k_per_core),
        in_specs=[pl.BlockSpec((B, TR, 128), in_map)],
        out_specs=pl.BlockSpec((1, B, 128), lambda c, k: (c, 0, 0)),
        compiler_params=pltpu.CompilerParams(
            dimension_semantics=("parallel", "arbitrary"),
            vmem_limit_bytes=vmem_limit),
    )(g3)

    # Tiny finalize wrapper-side (enables the 2-core split): O(NC*B*128) work.
    ss = jnp.sum(partials, axis=(0, 2))                  # [B] sum of squares
    norm = jnp.sqrt(ss)
    return jnp.mean((norm - 1.0) ** 2)


def gradient_penalty_loss(critic_fn, interp: jax.Array) -> jax.Array:
    """Equivalent of GradientPenaltyLoss.forward(interp, interp_crit=critic_fn(interp)).

    # TODO(synk): torch.autograd.grad has no in-kernel Pallas equivalent; the VJP is
    # taken with jax.vjp here (glue), only the norm/penalty reduction uses the kernel.
    """
    interp_crit, vjp_fn = jax.vjp(critic_fn, interp)
    grad_outputs = jnp.ones_like(interp_crit)            # get_grad_outputs: ones, same size
    (grad_interp,) = vjp_fn(grad_outputs)
    B = grad_interp.shape[0]
    grad_flat = grad_interp.reshape(B, -1)               # .view(B, -1), row-major flatten
    return gradient_penalty_from_grads(grad_flat)


def _reference_loss(critic_fn, interp):
    """Pure-JAX reference for validation."""
    interp_crit, vjp_fn = jax.vjp(critic_fn, interp)
    (g,) = vjp_fn(jnp.ones_like(interp_crit))
    g = g.reshape(g.shape[0], -1)
    n = jnp.sqrt(jnp.sum(g.astype(jnp.float32) ** 2, axis=1))
    return jnp.mean((n - 1.0) ** 2)


def _reference_from_grads(g):
    gf = g.astype(jnp.float32)
    n = jnp.sqrt(jnp.sum(gf * gf, axis=1))
    return jnp.mean((n - 1.0) ** 2)


if __name__ == "__main__":
    key = jax.random.PRNGKey(0)
    k_x, k_w, k_g1, k_g2 = jax.random.split(key, 4)

    B, C, H, W = 2, 4, 16, 16
    interp = jax.random.normal(k_x, (B, C, H, W), dtype=jnp.float32)

    # Simple deterministic differentiable "critic" producing a per-sample score
    # (stands in for the external critic network whose output is interp_crit).
    w_crit = jax.random.normal(k_w, (C, H, W), dtype=jnp.float32) * 0.1

    def critic_fn(x):
        return jnp.sum(jnp.tanh(x) * w_crit[None, ...], axis=(1, 2, 3))   # [B]

    loss = jax.block_until_ready(gradient_penalty_loss(critic_fn, interp))
    ref = jax.block_until_ready(_reference_loss(critic_fn, interp))
    assert jnp.allclose(loss, ref, rtol=1e-5, atol=1e-6), (loss, ref)

    # Multi-block grid + masked tail block + 2-core split with an empty trailing block
    # (R=41 rows, TR forced to 16 -> 3 blocks of 16/16/9, grid (2,2)).
    gA = jax.random.normal(k_g1, (B, 41 * 128), dtype=jnp.float32) * 0.05
    outA = jax.block_until_ready(gradient_penalty_from_grads(gA, max_block_rows=16))
    refA = jax.block_until_ready(_reference_from_grads(gA))
    assert jnp.allclose(outA, refA, rtol=1e-5, atol=1e-6), (outA, refA)

    # Non-128-aligned D (zero-pad path), single full-extent block.
    gB = jax.random.normal(k_g2, (B, 1000), dtype=jnp.float32) * 0.05
    outB = jax.block_until_ready(gradient_penalty_from_grads(gB))
    refB = jax.block_until_ready(_reference_from_grads(gB))
    assert jnp.allclose(outB, refB, rtol=1e-5, atol=1e-6), (outB, refB)

    # bf16 gradient: in-kernel widening cast with f32 accumulation.
    gC = gA.astype(jnp.bfloat16)
    outC = jax.block_until_ready(gradient_penalty_from_grads(gC))
    refC = jax.block_until_ready(_reference_from_grads(gC))
    assert jnp.allclose(outC, refC, rtol=1e-4, atol=1e-4), (outC, refC)

    print("KERNEL_OK")
</pallas_src>

<mosaic_0001>
module attributes {stable_mosaic.version = 11 : i64} {
  func.func @kernel(%arg0: i32, %arg1: i32, %arg2: memref<2x8x128xf32, #tpu.memory_space<vmem>>, %arg3: memref<1x2x128xf32, #tpu.memory_space<vmem>>) attributes {dimension_semantics = [#tpu.dimension_semantics<parallel>, #tpu.dimension_semantics<arbitrary>], iteration_bounds = array<i64: 1, 1>, scalar_prefetch = 0 : i64, scratch_operands = 0 : i64, tpu.core_type = #tpu.core_type<tc>, window_params = [{transform_indices = @transform_0, window_bounds = array<i64: 2, 8, 128>}, {transform_indices = @transform_1, window_bounds = array<i64: 1, 2, 128>}]} {
    %c0_i32 = arith.constant 0 : i32
    %0 = arith.cmpi eq, %arg1, %c0_i32 : i32
    %1 = arith.extui %0 : i1 to i32
    %c0_i32_0 = arith.constant 0 : i32
    %2 = arith.cmpi ne, %1, %c0_i32_0 : i32
    scf.if %2 {
      %cst_9 = arith.constant 0.000000e+00 : f32
      %10 = vector.broadcast %cst_9 : f32 to vector<1x2x128xf32>
      %c0_10 = arith.constant 0 : index
      %c0_11 = arith.constant 0 : index
      %c0_12 = arith.constant 0 : index
      %11 = vector.load %arg3[%c0_10, %c0_11, %c0_12] : memref<1x2x128xf32, #tpu.memory_space<vmem>>, vector<1x2x128xf32>
      tpu.vector_store %arg3[%c0_10, %c0_11, %c0_12], %10 {strides = array<i32>} : memref<1x2x128xf32, #tpu.memory_space<vmem>>, vector<1x2x128xf32>,
    } else {
    }
    %c0 = arith.constant 0 : index
    %c0_1 = arith.constant 0 : index
    %c0_2 = arith.constant 0 : index
    %3 = vector.load %arg2[%c0, %c0_1, %c0_2] : memref<2x8x128xf32, #tpu.memory_space<vmem>>, vector<2x8x128xf32>
    %c0_3 = arith.constant 0 : index
    %c0_4 = arith.constant 0 : index
    %c0_5 = arith.constant 0 : index
    %4 = vector.load %arg3[%c0_3, %c0_4, %c0_5] : memref<1x2x128xf32, #tpu.memory_space<vmem>>, vector<1x2x128xf32>
    %5 = arith.mulf %3, %3 : vector<2x8x128xf32>
    %cst = arith.constant dense<0.000000e+00> : vector<2x128xf32>
    %6 = vector.multi_reduction <add>, %5, %cst [1] : vector<2x8x128xf32> to vector<2x128xf32>
    %7 = vector.shape_cast %6 : vector<2x128xf32> to vector<1x2x128xf32>
    %8 = arith.addf %4, %7 : vector<1x2x128xf32>
    %c0_6 = arith.constant 0 : index
    %c0_7 = arith.constant 0 : index
    %c0_8 = arith.constant 0 : index
    %9 = vector.load %arg3[%c0_6, %c0_7, %c0_8] : memref<1x2x128xf32, #tpu.memory_space<vmem>>, vector<1x2x128xf32>
    tpu.vector_store %arg3[%c0_6, %c0_7, %c0_8], %8 {strides = array<i32>} : memref<1x2x128xf32, #tpu.memory_space<vmem>>, vector<1x2x128xf32>,
    return
  }
  func.func @transform_0(%arg0: i32, %arg1: i32) -> (i32, i32, i32) {
    %c1_i32 = arith.constant 1 : i32
    %0 = arith.muli %arg0, %c1_i32 : i32
    %1 = arith.addi %0, %arg1 : i32
    %c0_i32 = arith.constant 0 : i32
    %2 = arith.minsi %1, %c0_i32 : i32
    %c0_i32_0 = arith.constant 0 : i32
    %c0_i32_1 = arith.constant 0 : i32
    %c0_i32_2 = arith.constant 0 : i32
    return %c0_i32_0, %2, %c0_i32_1 : i32, i32, i32
  }
  func.func @transform_1(%arg0: i32, %arg1: i32) -> (i32, i32, i32) {
    %c0_i32 = arith.constant 0 : i32
    %c0_i32_0 = arith.constant 0 : i32
    %c0_i32_1 = arith.constant 0 : i32
    return %arg0, %c0_i32, %c0_i32_0 : i32, i32, i32
  }
}

</mosaic_0001>

<bundles_post_ra>
// kernel: tpu_custom_call.1
= control target key start
LH: loop header
LB: loop body
LE: loop exit
PB: predicated region body
PF: predicated region fallthrough
CT: control target
= control target key end

     0   :  { %6 = vsyncpa [#allocation3], 0  ;;  %s169_s0 = inlined_call_operand.hbm [shape: f32[2,8,128], index: 0, kind: input, shape index: {}]   ;;  %s170_s1 = inlined_call_operand.hbm [shape: f32[1,2,128], index: 1, kind: output, shape index: {}]  }
   0x1   :  { %7 = vsyncpa [#allocation4], 0  ;;  %s130_s6 = smov [#allocation2]   ;;  %s82_s10 = scalar_lea.hbm %s169_s0, 256 }
   0x2   :  { %s18_s7 = sshll.u32 %s130_s6, 4  ;;  %p83_p0 = scmp.ne.s32.totalorder %s169_s0, %s82_s10  ;;  %s19_s7 = int_to_ptr.vmem [resolvable:$true] %s18_s7 }
   0x3   :  { %p86_p1 = scmp.lt.u32.totalorder %s82_s10, %s169_s0 }
   0x5   :  { %p88_p2 = pnand %p86_p1, %p83_p0 }
   0x7   :  { %91 = shalt.err (!%p88_p2)
}
   0x8   :  { %s92_s15 = scalar_lea.vmem %s19_s7, 256  ;;  %p97_p4 = scmp.lt.s32.totalorder %s19_s7, %s19_s7 }
   0x9   :  { %p93_p3 = scmp.ne.s32.totalorder %s19_s7, %s92_s15  ;;  %p98_p5 = scmp.lt.s32.totalorder %s92_s15, %s92_s15 }
   0xb   :  { %p99_p6 = por %p98_p5, %p97_p4 }
   0xd   :  { %p100_p7 = pnand %p99_p6, %p93_p3 }
   0xf   :  { %103 = shalt.err (!%p100_p7)
}
  0x10   :  { %s131_s16 = smov 128   ;;  %s132_s17 = smov 8  }
  0x11   :  { %24 = dma.hbm_to_vmem [thread:$0]  %s169_s0, 256, %s19_s7, [#allocation3], %s131_s16, %s131_s16, %s132_s17  }
  0x12   :  { %126 = dma.done.wait [#allocation3], 256  }
  0x13   :  { %127 = vsyncadd [#allocation3], 4294967040  ;;  %v133_v0 = vmov 0.0   ;;  %v36_v1 = vld [vmem:[#allocation2] sm:$0xff]  ;;  %v37_v2 = vld [vmem:[#allocation2 + $0x8] sm:$0xff]  ;;  %vm55_vm0 = vcmask 1041409  }
  0x14   :  { %35 = vst [vmem:[#allocation5] sm:$0x3] %v133_v0  ;;  %v39_v3 = vmul.f32 %v36_v1, %v36_v1  ;;  %v40_v4 = vmul.f32 %v37_v2, %v37_v2  ;;  %s134_s0 = smov [#allocation5]  }
  0x15   :  { %s66_s20 = sshll.u32 %s134_s0, 4  ;;  %s67_s20 = int_to_ptr.vmem [resolvable:$true] %s66_s20 }
  0x16   :  { %v41_v5 = vrot.slane %v39_v3, 4  ;;  %v47_v6 = vrot.slane %v40_v4, 4  ;;  %s104_s21 = scalar_lea.vmem %s67_s20, 32  ;;  %p109_p9 = scmp.lt.s32.totalorder %s67_s20, %s67_s20 }
  0x17   :  { %p105_p8 = scmp.ne.s32.totalorder %s67_s20, %s104_s21  ;;  %p110_p10 = scmp.lt.s32.totalorder %s104_s21, %s104_s21 }
  0x18   :  { %v42_v7 = vadd.f32 %v41_v5, %v39_v3  ;;  %v48_v8 = vadd.f32 %v47_v6, %v40_v4 }
  0x19   :  { %p111_p11 = por %p110_p10, %p109_p9 }
  0x1a   :  { %v43_v9 = vrot.slane %v42_v7, 2  ;;  %v49_v10 = vrot.slane %v48_v8, 2 }
  0x1b   :  { %v38_v15 = vld [vmem:[#allocation5] sm:$0x3]  ;;  %p112_p12 = pnand %p111_p11, %p105_p8 }
  0x1c   :  { %v44_v11 = vadd.f32 %v43_v9, %v42_v7  ;;  %v50_v12 = vadd.f32 %v49_v10, %v48_v8 }
  0x1e   :  { %v45_v13 = vrot.slane %v44_v11, 1  ;;  %v51_v14 = vrot.slane %v50_v12, 1 }
  0x20   :  { %v46_v16 = vadd.f32 %v45_v13, %v44_v11  ;;  %v52_v17 = vadd.f32 %v51_v14, %v50_v12 }
  0x22   :  { %v56_v18 = vsel %vm55_vm0, %v52_v17, %v46_v16 }
  0x23   :  { %v58_v19 = vadd.f32 %v56_v18, %v38_v15 }
  0x25   :  { %59 = vst [vmem:[#allocation5] sm:$0x3] %v58_v19 }
  0x26   :  { %115 = shalt.err (!%p112_p12)
}
  0x27   :  { %s116_s24 = scalar_lea.hbm %s170_s1, 32 }
  0x28   :  { %p117_p13 = scmp.ne.s32.totalorder %s170_s1, %s116_s24  ;;  %p120_p0 = scmp.lt.u32.totalorder %s116_s24, %s170_s1 }
  0x2a   :  { %p122_p1 = pnand %p120_p0, %p117_p13 }
  0x2c   :  { %125 = shalt.err (!%p122_p1)
}
  0x2d   :  { %69 = dma.vmem_to_hbm [thread:$0]  %s67_s20, 32, %s170_s1, [#allocation4]  }
  0x2e   :  { %128 = dma.done.wait [#allocation4], 32  }
  0x2f   :  { %129 = vsyncadd [#allocation4], 4294967264 }
  0x30   :  { %73 = vsyncpa [#allocation3], 1 }
  0x31   :  { %74 = vsyncpa [#allocation4], 1 }

</bundles_post_ra>
